<compile_context>
chip_gen: v7x
topology: tpu7x:2x2x1
jax: 0.10.0
libtpu: 0.0.40
codegen_flags: <defaults>
</compile_context>

<pallas_src>
import functools

import jax
import jax.numpy as jnp
from jax.experimental import pallas as pl
from jax.experimental.pallas import tpu as pltpu


def _diag_gauss_var_kernel(x_ref, w_ref, b_ref, out_ref, *, softplus: bool, d_out: int):
    x = x_ref[...]                                   # [TB, D_in]
    # Fused heads: x [TB, D_in] . W [2*D_out, D_in] contracting D_in  ->  [TB, 2*D_out]
    z = jax.lax.dot_general(
        x, w_ref[...],
        dimension_numbers=(((1,), (1,)), ((), ())),
        preferred_element_type=jnp.float32,
    ) + b_ref[...].astype(jnp.float32)

    if softplus:
        # nn.Softplus(threshold=10): z if z > 10 else log1p(exp(z)).
        # Clamp before exp so huge z doesn't burn EUP cycles on an overflowing exp.
        e = jnp.exp(jnp.minimum(z, 10.0))
        var = jnp.where(z > 10.0, z, jnp.log1p(e))
        scale = jnp.sqrt(var)                        # std = sqrt(var)
    else:
        scale = jnp.exp(jnp.clip(z, -18.0, 2.0))     # std = exp(clamped logstd)

    # Columns [0, d_out) are the mean head, [d_out, 2*d_out) the std head.
    # Single full-width (lane-dense) store instead of two partial masked stores.
    col = jax.lax.broadcasted_iota(jnp.int32, z.shape, 1)
    out_ref[...] = jnp.where(col < d_out, z, scale).astype(out_ref.dtype)


def diag_gaussian_variance(x, w_mean, b_mean, w_second, b_second, *,
                           softplus=False, block_b=4096):
    """x: [B, D_in]; w_*: [D_out, D_in] (torch Linear layout); b_*: [D_out].

    Returns (mean, std) of the Normal distribution produced by the module.
    `w_second`/`b_second` is fc_logstd when softplus=False, fc_var when softplus=True.
    """
    B, D_in = x.shape
    D_out = w_mean.shape[0]
    D2 = 2 * D_out

    # Fuse the two heads (no transpose: kernel contracts on the last axis of W).
    w_fused = jnp.concatenate([w_mean, w_second], axis=0)          # [2*D_out, D_in]
    b_fused = jnp.concatenate([b_mean, b_second]).reshape(1, D2)   # [1, 2*D_out]

    tb = B if B <= block_b else block_b
    grid = (pl.cdiv(B, tb),)

    kernel = functools.partial(_diag_gauss_var_kernel, softplus=softplus, d_out=D_out)

    fused = pl.pallas_call(
        kernel,
        out_shape=jax.ShapeDtypeStruct((B, D2), x.dtype),
        grid=grid,
        in_specs=[
            pl.BlockSpec((tb, D_in), lambda i: (i, 0)),     # x tile: streamed / pipelined
            pl.BlockSpec((D2, D_in), lambda i: (0, 0)),     # fused weights: VMEM-resident
            pl.BlockSpec((1, D2), lambda i: (0, 0)),        # fused bias:   VMEM-resident
        ],
        out_specs=pl.BlockSpec((tb, D2), lambda i: (i, 0)),
        compiler_params=pltpu.CompilerParams(dimension_semantics=("parallel",)),
    )(x, w_fused, b_fused)

    mean = fused[:, :D_out]
    std = fused[:, D_out:]
    # TODO(synk): use_double=True path (cast to float64) not supported on TPU Pallas.
    return mean, std


def _orthogonal_init(key, rows, cols):
    # Deterministic orthogonal init (matches nn.init.orthogonal_ semantics).
    a = jax.random.normal(key, (max(rows, cols), min(rows, cols)), jnp.float32)
    q, r = jnp.linalg.qr(a)
    q = q * jnp.sign(jnp.diag(r))[None, :]
    if rows < cols:
        q = q.T
    return q[:rows, :cols]


if __name__ == "__main__":
    num_inputs, num_outputs, batch = 32, 8, 8

    key = jax.random.PRNGKey(0)
    k_x, k_wm, k_ws = jax.random.split(key, 3)

    x = jax.random.normal(k_x, (batch, num_inputs), jnp.float32)
    w_mean = _orthogonal_init(k_wm, num_outputs, num_inputs)
    w_second = _orthogonal_init(k_ws, num_outputs, num_inputs)
    b_mean = jnp.zeros((num_outputs,), jnp.float32)    # nn.init.constant_(x, 0)
    b_second = jnp.zeros((num_outputs,), jnp.float32)

    # --- softplus=False path: Normal(mean, exp(clamp(logstd, -18, 2))) ---
    mean, std = diag_gaussian_variance(x, w_mean, b_mean, w_second, b_second,
                                       softplus=False)
    jax.block_until_ready((mean, std))
    ref_mean = x @ w_mean.T + b_mean
    ref_std = jnp.exp(jnp.clip(x @ w_second.T + b_second, -18.0, 2.0))
    assert jnp.allclose(mean, ref_mean, atol=1e-5, rtol=1e-5)
    assert jnp.allclose(std, ref_std, atol=1e-5, rtol=1e-5)
    assert bool(jnp.all(std > 0.0))

    # --- softplus=True path: Normal(mean, sqrt(softplus_thresh10(var_pre))) ---
    mean2, std2 = diag_gaussian_variance(x, w_mean, b_mean, w_second, b_second,
                                         softplus=True)
    jax.block_until_ready((mean2, std2))
    zv = x @ w_second.T + b_second
    ref_var = jnp.where(zv > 10.0, zv, jnp.log1p(jnp.exp(zv)))
    ref_std2 = jnp.sqrt(ref_var)
    assert jnp.allclose(mean2, ref_mean, atol=1e-5, rtol=1e-5)
    assert jnp.allclose(std2, ref_std2, atol=1e-5, rtol=1e-5)

    print("KERNEL_OK")
</pallas_src>

<mosaic_0001>
module attributes {stable_mosaic.version = 11 : i64} {
  func.func @_diag_gauss_var_kernel(%arg0: i32, %arg1: memref<8x32xf32, #tpu.memory_space<vmem>>, %arg2: memref<16x32xf32, #tpu.memory_space<vmem>>, %arg3: memref<1x16xf32, #tpu.memory_space<vmem>>, %arg4: memref<8x16xf32, #tpu.memory_space<vmem>>) attributes {dimension_semantics = [#tpu.dimension_semantics<parallel>], iteration_bounds = array<i64: 1>, scalar_prefetch = 0 : i64, scratch_operands = 0 : i64, tpu.core_type = #tpu.core_type<tc>, window_params = [{transform_indices = @transform_0, window_bounds = array<i64: 8, 32>}, {pipeline_mode = #tpu.pipeline_mode<synchronous>, transform_indices = @transform_1, window_bounds = array<i64: 16, 32>}, {pipeline_mode = #tpu.pipeline_mode<synchronous>, transform_indices = @transform_2, window_bounds = array<i64: 1, 16>}, {transform_indices = @transform_3, window_bounds = array<i64: 8, 16>}]} {
    %c0 = arith.constant 0 : index
    %c0_0 = arith.constant 0 : index
    %0 = vector.load %arg1[%c0, %c0_0] : memref<8x32xf32, #tpu.memory_space<vmem>>, vector<8x32xf32>
    %c0_1 = arith.constant 0 : index
    %c0_2 = arith.constant 0 : index
    %1 = vector.load %arg2[%c0_1, %c0_2] : memref<16x32xf32, #tpu.memory_space<vmem>>, vector<16x32xf32>
    %cst = arith.constant dense<0.000000e+00> : vector<8x16xf32>
    %2 = tpu.matmul %0, %1, %cst {dimension_numbers = #tpu.dot_dimension_numbers<[1], [1], [0], [0], [0, 0, 1, 0], [], []>} : vector<8x32xf32>, vector<16x32xf32>, vector<8x16xf32> -> vector<8x16xf32>
    %c0_3 = arith.constant 0 : index
    %c0_4 = arith.constant 0 : index
    %3 = vector.load %arg3[%c0_3, %c0_4] : memref<1x16xf32, #tpu.memory_space<vmem>>, vector<1x16xf32>
    %4 = vector.broadcast %3 : vector<1x16xf32> to vector<8x16xf32>
    %5 = arith.addf %2, %4 : vector<8x16xf32>
    %cst_5 = arith.constant -1.800000e+01 : f32
    %cst_6 = arith.constant 2.000000e+00 : f32
    %6 = vector.broadcast %cst_5 : f32 to vector<8x16xf32>
    %7 = arith.maximumf %6, %5 : vector<8x16xf32>
    %8 = vector.broadcast %cst_6 : f32 to vector<8x16xf32>
    %9 = arith.minimumf %8, %7 : vector<8x16xf32>
    %10 = math.exp %9 : vector<8x16xf32>
    %11 = tpu.iota {dimensions = array<i32: 1>} : vector<8x16xi32>
    %c8_i32 = arith.constant 8 : i32
    %12 = vector.broadcast %c8_i32 : i32 to vector<8x16xi32>
    %13 = arith.cmpi slt, %11, %12 : vector<8x16xi32>
    %14 = arith.select %13, %5, %10 : vector<8x16xi1>, vector<8x16xf32>
    %c0_7 = arith.constant 0 : index
    %c0_8 = arith.constant 0 : index
    %15 = vector.load %arg4[%c0_7, %c0_8] : memref<8x16xf32, #tpu.memory_space<vmem>>, vector<8x16xf32>
    tpu.vector_store %arg4[%c0_7, %c0_8], %14 {strides = array<i32>} : memref<8x16xf32, #tpu.memory_space<vmem>>, vector<8x16xf32>,
    return
  }
  func.func @transform_0(%arg0: i32) -> (i32, i32) {
    %c0_i32 = arith.constant 0 : i32
    %c0_i32_0 = arith.constant 0 : i32
    return %arg0, %c0_i32 : i32, i32
  }
  func.func @transform_1(%arg0: i32) -> (i32, i32) {
    %c0_i32 = arith.constant 0 : i32
    %c0_i32_0 = arith.constant 0 : i32
    %c0_i32_1 = arith.constant 0 : i32
    return %c0_i32, %c0_i32_0 : i32, i32
  }
  func.func @transform_2(%arg0: i32) -> (i32, i32) {
    %c0_i32 = arith.constant 0 : i32
    %c0_i32_0 = arith.constant 0 : i32
    %c0_i32_1 = arith.constant 0 : i32
    return %c0_i32, %c0_i32_0 : i32, i32
  }
  func.func @transform_3(%arg0: i32) -> (i32, i32) {
    %c0_i32 = arith.constant 0 : i32
    %c0_i32_0 = arith.constant 0 : i32
    return %arg0, %c0_i32 : i32, i32
  }
}

</mosaic_0001>

<bundles_post_ra>
// kernel: tpu_custom_call.1
= control target key start
LH: loop header
LB: loop body
LE: loop exit
PB: predicated region body
PF: predicated region fallthrough
CT: control target
= control target key end

     0   :  { %8 = vsyncpa [#allocation3], 0  ;;  %s331_s0 = inlined_call_operand.hbm [shape: f32[8,32], index: 0, kind: input, shape index: {}]   ;;  %s332_s1 = inlined_call_operand.hbm [shape: f32[16,32], index: 1, kind: input, shape index: {}]   ;;  %s333_s2 = inlined_call_operand.vmem [shape: f32[1,16], index: 2, kind: input, shape index: {}]   ;;  %s334_s3 = inlined_call_operand.hbm [shape: f32[8,16], index: 3, kind: output, shape index: {}]  }
   0x1   :  { %9 = vsyncpa [#allocation6], 0 }
   0x2   :  { %10 = vsyncpa [#allocation4], 0  ;;  %s257_s12 = smov [#allocation2]   ;;  %s258_s14 = smov [#allocation5]  }
   0x3   :  { %s17_s13 = sshll.u32 %s257_s12, 4  ;;  %s26_s15 = sshll.u32 %s258_s14, 4  ;;  %s18_s13 = int_to_ptr.vmem [resolvable:$true] %s17_s13  ;;  %s285_s15 = int_to_ptr.vmem [resolvable:$true] %s26_s15 }
   0x4   :  { %s185_s18 = scalar_lea.hbm %s331_s0, 128 }
   0x5   :  { %p186_p0 = scmp.ne.s32.totalorder %s331_s0, %s185_s18  ;;  %p189_p1 = scmp.lt.u32.totalorder %s185_s18, %s331_s0 }
   0x7   :  { %p191_p2 = pnand %p189_p1, %p186_p0 }
   0x9   :  { %194 = shalt.err (!%p191_p2)
}
   0xa   :  { %s195_s23 = scalar_lea.vmem %s18_s13, 128  ;;  %p200_p4 = scmp.lt.s32.totalorder %s18_s13, %s18_s13 }
   0xb   :  { %p196_p3 = scmp.ne.s32.totalorder %s18_s13, %s195_s23  ;;  %p201_p5 = scmp.lt.s32.totalorder %s195_s23, %s195_s23 }
   0xd   :  { %p202_p6 = por %p201_p5, %p200_p4 }
   0xf   :  { %p203_p7 = pnand %p202_p6, %p196_p3 }
  0x11   :  { %206 = shalt.err (!%p203_p7)
}
  0x12   :  { %20 = dma.hbm_to_vmem [thread:$0]  %s331_s0, 128, %s18_s13, [#allocation3]  }
  0x13   :  { %s207_s28 = scalar_lea.hbm %s332_s1, 256 }
  0x14   :  { %p208_p8 = scmp.ne.s32.totalorder %s332_s1, %s207_s28  ;;  %p211_p9 = scmp.lt.u32.totalorder %s207_s28, %s332_s1 }
  0x16   :  { %p213_p10 = pnand %p211_p9, %p208_p8 }
  0x18   :  { %216 = shalt.err (!%p213_p10)
}
  0x19   :  { %s217_s6 = scalar_lea.vmem %s285_s15, 256  ;;  %p222_p12 = scmp.lt.s32.totalorder %s285_s15, %s285_s15 }
  0x1a   :  { %p218_p11 = scmp.ne.s32.totalorder %s285_s15, %s217_s6  ;;  %p223_p13 = scmp.lt.s32.totalorder %s217_s6, %s217_s6 }
  0x1c   :  { %p224_p0 = por %p223_p13, %p222_p12 }
  0x1e   :  { %p225_p1 = pnand %p224_p0, %p218_p11 }
  0x20   :  { %228 = shalt.err (!%p225_p1)
}
  0x21   :  { %s259_s0 = smov 128   ;;  %s260_s7 = smov 8  }
  0x22   :  { %32 = dma.hbm_to_vmem [thread:$0]  %s332_s1, 256, %s285_s15, [#allocation6], %s259_s0, %s259_s0, %s260_s7  }
  0x23   :  { %251 = dma.done.wait [#allocation3], 128  }
  0x24   :  { %252 = vsyncadd [#allocation3], 4294967168 }
  0x25   :  { %253 = dma.done.wait [#allocation6], 256  }
  0x26   :  { %254 = vsyncadd [#allocation6], 4294967040  ;;  %v261_v0 = vmov 0.0|0.0   ;;  %vm262_vm0 = vmmov 0   ;;  %v263_v1 = vmov 0.0   ;;  %vm51_vm1 = vcmask 261120  }
  0x27   :  { %171 = vmatprep.subr.bf16.mxu0 %v261_v0  ;;  %168 = vmatprep.mubr.msk.f32.mxu0 %vm262_vm0, %v263_v1  ;;  %v42_v2 = vld [vmem:[#allocation5] sm:$0xff]  ;;  %v43_v3 = vld [vmem:[#allocation5 + $0x8] sm:$0xff]  ;;  %vm173_vm2 = vmpackc.low %vm51_vm1, %vm51_vm1  ;;  %v135_v13 = vlaneseq  ;;  %s264_s1 = smov [#allocation7]   ;;  %vm139_vm4 = vcmask 130048  }
  0x28   :  { %v172_v4 = vpack.c.bf16 %v43_v3, %v42_v2  ;;  %v41_v5 = vld [vmem:[#allocation2] sm:$0xff]  ;;  %s147_s12 = sshll.u32 %s264_s1, 4  ;;  %s148_s12 = int_to_ptr.vmem [resolvable:$true] %s147_s12 }
  0x29   :  { %v157_v6 = vld [vmem:[%s333_s2] ss:$0 sm:$0xff]  ;;  %v136_v14 = vand.u32 127, %v135_v13  ;;  %s229_s13 = scalar_lea.vmem %s148_s12, 128  ;;  %p234_p3 = scmp.lt.s32.totalorder %s148_s12, %s148_s12 }
  0x2a   :  { %174 = vmatpush3.bf16.xpose.msk.msra.mxu0 %vm173_vm2, %v172_v4  ;;  %p230_p2 = scmp.ne.s32.totalorder %s148_s12, %s229_s13  ;;  %p235_p4 = scmp.lt.s32.totalorder %s229_s13, %s229_s13 }
  0x2b   :  { %vm137_vm3 = vcmp.lt.s32.totalorder %v136_v14, 8 }
  0x2c   :  { %p236_p5 = por %p235_p4, %p234_p3 }
  0x2e   :  { %p237_p6 = pnand %p236_p5, %p230_p2 }
  0x31   :  { %169 = vmatmul.mubr.msk.f32.vlgmr.msra.gmra.mrb[0].mxu0 %vm51_vm1, %v41_v5 }
 0x104   :  { %v127_v7 = vpop.f32.mrb[0].mxu0 }
 0x105   :  { %v128_v8 = vadd.f32 %v157_v6, %v127_v7  ;;  %v170_v9 = vpop.f32.mrb[1].mxu0 }
 0x107   :  { %v131_v10 = vmax.f32 %v128_v8, -18.0 }
 0x109   :  { %v132_v11 = vmin.f32 %v131_v10, 2.0 }
 0x10b   :  { %v133_v12 = vmul.f32 1.442695, %v132_v11 }
 0x10d   :  { %183 = vpow2.f32 %v133_v12 }
 0x117   :  { %v184_v15 = vpop.eup %183 }
 0x118   :  { %v138_v16 = vsel %vm137_vm3, %v128_v8, %v184_v15 }
 0x119   :  { %140 = vst.msk [vmem:[#allocation7] sm:$0xff] %vm139_vm4, %v138_v16 }
 0x11a   :  { %240 = shalt.err (!%p237_p6)
}
 0x11b   :  { %s241_s15 = scalar_lea.hbm %s334_s3, 128 }
 0x11c   :  { %p242_p7 = scmp.ne.s32.totalorder %s334_s3, %s241_s15  ;;  %p245_p8 = scmp.lt.u32.totalorder %s241_s15, %s334_s3 }
 0x11e   :  { %p247_p9 = pnand %p245_p8, %p242_p7 }
 0x120   :  { %250 = shalt.err (!%p247_p9)
}
 0x121   :  { %150 = dma.vmem_to_hbm [thread:$0]  %s148_s12, 128, %s334_s3, [#allocation4]  }
 0x122   :  { %255 = dma.done.wait [#allocation4], 128  }
 0x123   :  { %256 = vsyncadd [#allocation4], 4294967168 }
 0x124   :  { %154 = vsyncpa [#allocation3], 1 }
 0x125   :  { %155 = vsyncpa [#allocation6], 1 }
 0x126   :  { %156 = vsyncpa [#allocation4], 1 }

</bundles_post_ra>
